<compile_context>
chip_gen: v7x
topology: tpu7x:2x2x1
jax: 0.10.0
libtpu: 0.0.40
codegen_flags: <defaults>
</compile_context>

<pallas_src>
import jax
import jax.numpy as jnp
from jax.experimental import pallas as pl
from jax.experimental.pallas import tpu as pltpu


def _fused_linear_cat_kernel(x_ref, m_ref, b_ref, o_ref):
    # x_ref: (tile_rows, 128)  -- 64 original (row, 2)-pairs per reshaped row
    # m_ref: (128, 384)        -- block-diagonal: 64 copies of [W^T | 0]
    # b_ref: (1, 384)          -- 64 copies of [bias | 0]
    # o_ref: (tile_rows, 384)  -- 64 original (row, 6)-outputs per reshaped row
    o_ref[...] = (
        jnp.dot(x_ref[...], m_ref[...], preferred_element_type=jnp.float32)
        + b_ref[...]
    ).astype(o_ref.dtype)


def fused_linear_cat(x1, weight, bias, *, tile_rows=1024):
    """x1: (B, S, Din) f32, weight: (Dout, Din), bias: (Dout,) -> (B, S, 2*Dout).

    Equivalent to: cat([x1 @ W^T + b, zeros(B, S, Dout)], axis=2).
    """
    B, S, Din = x1.shape
    Dout, Din_w = weight.shape
    assert Din == Din_w
    assert 128 % Din == 0, "lane packing assumes Din divides 128"
    dtype = jnp.float32

    R = 128 // Din          # original rows packed per lane-dense row (64)
    Cout = 2 * Dout         # cat([fc(x), m]) width (6)
    Lin = R * Din           # reshaped input width  (128)
    Lout = R * Cout         # reshaped output width (384)

    N = B * S
    # Pad rows to a multiple of 8*R so the reshaped row count is sublane-aligned.
    N_pad = ((N + 8 * R - 1) // (8 * R)) * (8 * R)
    n_rows = N_pad // R     # reshaped rows (multiple of 8)

    x_flat = x1.reshape(N, Din).astype(dtype)
    if N_pad != N:
        x_flat = jnp.pad(x_flat, ((0, N_pad - N), (0, 0)))
    x_lane = x_flat.reshape(n_rows, Lin)            # free row-major reshape

    # Host-built block-diagonal weight slab and lane-dense bias row.
    blk = jnp.concatenate(
        [weight.T.astype(dtype), jnp.zeros((Din, Dout), dtype)], axis=1)  # (Din, Cout)
    m_blockdiag = jnp.kron(jnp.eye(R, dtype=dtype), blk)                  # (Lin, Lout)
    b_lane = jnp.tile(
        jnp.concatenate([bias.astype(dtype), jnp.zeros((Dout,), dtype)]), R
    ).reshape(1, Lout)

    # Sublane-aligned tile of reshaped rows.
    tile_rows = max(8, (tile_rows // 8) * 8)
    tile_rows = min(tile_rows, n_rows)
    grid = (pl.cdiv(n_rows, tile_rows),)

    cost = pl.CostEstimate(
        flops=2 * n_rows * Lin * Lout,
        transcendentals=0,
        bytes_accessed=4 * (n_rows * Lin + n_rows * Lout + Lin * Lout + Lout),
    )

    out_lane = pl.pallas_call(
        _fused_linear_cat_kernel,
        out_shape=jax.ShapeDtypeStruct((n_rows, Lout), dtype),
        grid=grid,
        in_specs=[
            pl.BlockSpec((tile_rows, Lin), lambda i: (i, 0)),
            pl.BlockSpec((Lin, Lout), lambda i: (0, 0)),
            pl.BlockSpec((1, Lout), lambda i: (0, 0)),
        ],
        out_specs=pl.BlockSpec((tile_rows, Lout), lambda i: (i, 0)),
        compiler_params=pltpu.CompilerParams(
            dimension_semantics=("parallel",),
        ),
        cost_estimate=cost,
    )(x_lane, m_blockdiag, b_lane)

    out_flat = out_lane.reshape(N_pad, Cout)        # free row-major reshape
    if N_pad != N:
        out_flat = out_flat[:N]
    return out_flat.reshape(B, S, Cout)


if __name__ == "__main__":
    key = jax.random.PRNGKey(0)
    k_x, k_w, k_b, k_x2, k_x3 = jax.random.split(key, 5)

    B, S, Din, Dout = 2, 2, 2, 3

    # Deterministic parameter init (PyTorch Linear-style uniform bound).
    bound = 1.0 / (Din ** 0.5)
    weight = jax.random.uniform(k_w, (Dout, Din), jnp.float32, -bound, bound)
    bias = jax.random.uniform(k_b, (Dout,), jnp.float32, -bound, bound)

    def reference(x):
        b_, s_, _ = x.shape
        return jnp.concatenate(
            [x @ weight.T + bias, jnp.zeros((b_, s_, Dout), jnp.float32)], axis=2)

    # Small case (matches the module's implied shapes); heavy row padding path.
    x1 = jax.random.normal(k_x, (B, S, Din), jnp.float32)
    out = jax.block_until_ready(fused_linear_cat(x1, weight, bias))
    assert out.shape == (B, S, 2 * Dout)
    assert jnp.allclose(out, reference(x1), atol=1e-5), "mismatch (small)"

    # Unaligned row count: N = 1200 -> padded to 1536, grid of 3 (partial pad tail).
    x2 = jax.random.normal(k_x2, (2, 600, Din), jnp.float32)
    out2 = jax.block_until_ready(fused_linear_cat(x2, weight, bias, tile_rows=8))
    assert jnp.allclose(out2, reference(x2), atol=1e-5), "mismatch (padded)"

    # Aligned multi-tile case: N = 4096 -> 64 lane-dense rows, grid of 4, no pad.
    x3 = jax.random.normal(k_x3, (4, 1024, Din), jnp.float32)
    out3 = jax.block_until_ready(fused_linear_cat(x3, weight, bias, tile_rows=16))
    assert jnp.allclose(out3, reference(x3), atol=1e-5), "mismatch (tiled)"

    print("KERNEL_OK")
</pallas_src>

<mosaic_0001>
module attributes {stable_mosaic.version = 11 : i64} {
  func.func @_fused_linear_cat_kernel(%arg0: i32, %arg1: memref<8x128xf32, #tpu.memory_space<vmem>>, %arg2: memref<128x384xf32, #tpu.memory_space<vmem>>, %arg3: memref<1x384xf32, #tpu.memory_space<vmem>>, %arg4: memref<8x384xf32, #tpu.memory_space<vmem>>) attributes {dimension_semantics = [#tpu.dimension_semantics<parallel>], iteration_bounds = array<i64: 1>, scalar_prefetch = 0 : i64, scratch_operands = 0 : i64, tpu.core_type = #tpu.core_type<tc>, window_params = [{transform_indices = @transform_0, window_bounds = array<i64: 8, 128>}, {pipeline_mode = #tpu.pipeline_mode<synchronous>, transform_indices = @transform_1, window_bounds = array<i64: 128, 384>}, {pipeline_mode = #tpu.pipeline_mode<synchronous>, transform_indices = @transform_2, window_bounds = array<i64: 1, 384>}, {transform_indices = @transform_3, window_bounds = array<i64: 8, 384>}]} {
    %c0 = arith.constant 0 : index
    %c0_0 = arith.constant 0 : index
    %0 = vector.load %arg1[%c0, %c0_0] : memref<8x128xf32, #tpu.memory_space<vmem>>, vector<8x128xf32>
    %c0_1 = arith.constant 0 : index
    %c0_2 = arith.constant 0 : index
    %1 = vector.load %arg2[%c0_1, %c0_2] : memref<128x384xf32, #tpu.memory_space<vmem>>, vector<128x384xf32>
    %cst = arith.constant dense<0.000000e+00> : vector<8x384xf32>
    %2 = tpu.matmul %0, %1, %cst {dimension_numbers = #tpu.dot_dimension_numbers<[1], [0], [0], [1], [0, 0, 1, 1], [], []>} : vector<8x128xf32>, vector<128x384xf32>, vector<8x384xf32> -> vector<8x384xf32>
    %c0_3 = arith.constant 0 : index
    %c0_4 = arith.constant 0 : index
    %3 = vector.load %arg3[%c0_3, %c0_4] : memref<1x384xf32, #tpu.memory_space<vmem>>, vector<1x384xf32>
    %4 = vector.broadcast %3 : vector<1x384xf32> to vector<8x384xf32>
    %5 = arith.addf %2, %4 : vector<8x384xf32>
    %c0_5 = arith.constant 0 : index
    %c0_6 = arith.constant 0 : index
    %6 = vector.load %arg4[%c0_5, %c0_6] : memref<8x384xf32, #tpu.memory_space<vmem>>, vector<8x384xf32>
    tpu.vector_store %arg4[%c0_5, %c0_6], %5 {strides = array<i32>} : memref<8x384xf32, #tpu.memory_space<vmem>>, vector<8x384xf32>,
    return
  }
  func.func @transform_0(%arg0: i32) -> (i32, i32) {
    %c0_i32 = arith.constant 0 : i32
    %c0_i32_0 = arith.constant 0 : i32
    return %arg0, %c0_i32 : i32, i32
  }
  func.func @transform_1(%arg0: i32) -> (i32, i32) {
    %c0_i32 = arith.constant 0 : i32
    %c0_i32_0 = arith.constant 0 : i32
    %c0_i32_1 = arith.constant 0 : i32
    return %c0_i32, %c0_i32_0 : i32, i32
  }
  func.func @transform_2(%arg0: i32) -> (i32, i32) {
    %c0_i32 = arith.constant 0 : i32
    %c0_i32_0 = arith.constant 0 : i32
    %c0_i32_1 = arith.constant 0 : i32
    return %c0_i32, %c0_i32_0 : i32, i32
  }
  func.func @transform_3(%arg0: i32) -> (i32, i32) {
    %c0_i32 = arith.constant 0 : i32
    %c0_i32_0 = arith.constant 0 : i32
    return %arg0, %c0_i32 : i32, i32
  }
}

</mosaic_0001>

<bundles_post_ra>
// kernel: tpu_custom_call.1
= control target key start
LH: loop header
LB: loop body
LE: loop exit
PB: predicated region body
PF: predicated region fallthrough
CT: control target
= control target key end

     0   :  { %8 = vsyncpa [#allocation3], 0  ;;  %s537_s0 = inlined_call_operand.hbm [shape: f32[8,128], index: 0, kind: input, shape index: {}]   ;;  %s538_s1 = inlined_call_operand.hbm [shape: f32[128,384], index: 1, kind: input, shape index: {}]   ;;  %s539_s2 = inlined_call_operand.vmem [shape: f32[1,384], index: 2, kind: input, shape index: {}]   ;;  %s540_s3 = inlined_call_operand.hbm [shape: f32[8,384], index: 3, kind: output, shape index: {}]  }
   0x1   :  { %9 = vsyncpa [#allocation6], 0 }
   0x2   :  { %10 = vsyncpa [#allocation4], 0  ;;  %s455_s12 = smov [#allocation2]   ;;  %s456_s14 = smov [#allocation5]  }
   0x3   :  { %s17_s13 = sshll.u32 %s455_s12, 4  ;;  %s26_s15 = sshll.u32 %s456_s14, 4  ;;  %s18_s13 = int_to_ptr.vmem [resolvable:$true] %s17_s13  ;;  %s483_s15 = int_to_ptr.vmem [resolvable:$true] %s26_s15 }
   0x4   :  { %s383_s18 = scalar_lea.hbm %s537_s0, 128 }
   0x5   :  { %p384_p0 = scmp.ne.s32.totalorder %s537_s0, %s383_s18  ;;  %p387_p1 = scmp.lt.u32.totalorder %s383_s18, %s537_s0 }
   0x7   :  { %p389_p2 = pnand %p387_p1, %p384_p0 }
   0x9   :  { %392 = shalt.err (!%p389_p2)
}
   0xa   :  { %s393_s23 = scalar_lea.vmem %s18_s13, 128  ;;  %p398_p4 = scmp.lt.s32.totalorder %s18_s13, %s18_s13 }
   0xb   :  { %p394_p3 = scmp.ne.s32.totalorder %s18_s13, %s393_s23  ;;  %p399_p5 = scmp.lt.s32.totalorder %s393_s23, %s393_s23 }
   0xd   :  { %p400_p6 = por %p399_p5, %p398_p4 }
   0xf   :  { %p401_p7 = pnand %p400_p6, %p394_p3 }
  0x11   :  { %404 = shalt.err (!%p401_p7)
}
  0x12   :  { %20 = dma.hbm_to_vmem [thread:$0]  %s537_s0, 128, %s18_s13, [#allocation3]  }
  0x13   :  { %s405_s28 = scalar_lea.hbm %s538_s1, 6144 }
  0x14   :  { %p406_p8 = scmp.ne.s32.totalorder %s538_s1, %s405_s28  ;;  %p409_p9 = scmp.lt.u32.totalorder %s405_s28, %s538_s1 }
  0x16   :  { %p411_p10 = pnand %p409_p9, %p406_p8 }
  0x18   :  { %414 = shalt.err (!%p411_p10)
}
  0x19   :  { %s415_s6 = scalar_lea.vmem %s483_s15, 6144  ;;  %p420_p12 = scmp.lt.s32.totalorder %s483_s15, %s483_s15 }
  0x1a   :  { %p416_p11 = scmp.ne.s32.totalorder %s483_s15, %s415_s6  ;;  %p421_p13 = scmp.lt.s32.totalorder %s415_s6, %s415_s6 }
  0x1c   :  { %p422_p0 = por %p421_p13, %p420_p12 }
  0x1e   :  { %p423_p1 = pnand %p422_p0, %p416_p11 }
  0x20   :  { %426 = shalt.err (!%p423_p1)
}
  0x21   :  { %s457_s0 = smov 384   ;;  %s458_s7 = smov 24  }
  0x22   :  { %32 = dma.hbm_to_vmem [thread:$0]  %s538_s1, 6144, %s483_s15, [#allocation6], %s457_s0, %s457_s0, %s458_s7  }
  0x23   :  { %449 = dma.done.wait [#allocation3], 128  }
  0x24   :  { %450 = vsyncadd [#allocation3], 4294967168 }
  0x25   :  { %451 = dma.done.wait [#allocation6], 6144  }
  0x26   :  { %452 = vsyncadd [#allocation6], 4294961152  ;;  %v459_v0 = vmov 0.0|0.0   ;;  %v460_v1 = vmov 0.0   ;;  %vm461_vm0 = vmmov 0   ;;  %v43_v2 = vld [vmem:[#allocation5 + $0x8] sm:$0xff] }
  0x27   :  { %351 = vmatprep.subr.bf16.mxu1 %v459_v0  ;;  %171 = vmatprep.mubr.f32.mxu0 %v460_v1  ;;  %v46_v3 = vld [vmem:[#allocation5 + $0x20] sm:$0xff]  ;;  %v45_v6 = vld [vmem:[#allocation5 + $0x18] sm:$0xff]  ;;  %v44_v7 = vld [vmem:[#allocation5 + $0x10] sm:$0xff]  ;;  %s462_s11 = smov [#allocation7]  }
  0x28   :  { %316 = vmatprep.mubr.msk.f32.mxu1 %vm461_vm0, %v460_v1  ;;  %v42_v4 = vld [vmem:[#allocation5] sm:$0xff]  ;;  %v319_v5 = vpack.c.bf16 %v46_v3, %v43_v2  ;;  %v47_v8 = vld [vmem:[#allocation5 + $0x28] sm:$0xff]  ;;  %v49_v11 = vld [vmem:[#allocation5 + $0x38] sm:$0xff]  ;;  %s257_s12 = sshll.u32 %s462_s11, 4  ;;  %s258_s12 = int_to_ptr.vmem [resolvable:$true] %s257_s12 }
  0x29   :  { %v321_v9 = vpack.c.bf16 %v45_v6, %v42_v4  ;;  %v352_v10 = vpack.c.bf16 %v47_v8, %v44_v7  ;;  %v52_v12 = vld [vmem:[#allocation5 + $0x50] sm:$0xff]  ;;  %v51_v15 = vld [vmem:[#allocation5 + $0x48] sm:$0xff]  ;;  %v50_v16 = vld [vmem:[#allocation5 + $0x40] sm:$0xff]  ;;  %s427_s13 = scalar_lea.vmem %s258_s12, 384  ;;  %p432_p3 = scmp.lt.s32.totalorder %s258_s12, %s258_s12 }
  0x2a   :  { %v48_v13 = vld [vmem:[#allocation5 + $0x30] sm:$0xff]  ;;  %320 = vmatprep.subr.bf16.mxu0 %v319_v5  ;;  %v323_v14 = vpack.c.bf16 %v52_v12, %v49_v11  ;;  %v53_v17 = vld [vmem:[#allocation5 + $0x58] sm:$0xff]  ;;  %v55_v20 = vld [vmem:[#allocation5 + $0x68] sm:$0xff]  ;;  %v92_v12 = vlaneseq  ;;  %p428_p2 = scmp.ne.s32.totalorder %s258_s12, %s427_s13  ;;  %p433_p4 = scmp.lt.s32.totalorder %s427_s13, %s427_s13 }
  0x2b   :  { %322 = vmatpush1.bf16.msra.mxu0 %v321_v9  ;;  %353 = vmatpush3.bf16.msra.mxu1 %v352_v10  ;;  %v325_v18 = vpack.c.bf16 %v51_v15, %v48_v13  ;;  %v355_v19 = vpack.c.bf16 %v53_v17, %v50_v16  ;;  %v58_v21 = vld [vmem:[#allocation5 + $0x80] sm:$0xff]  ;;  %v57_v24 = vld [vmem:[#allocation5 + $0x78] sm:$0xff]  ;;  %v56_v25 = vld [vmem:[#allocation5 + $0x70] sm:$0xff] }
  0x2c   :  { %v54_v22 = vld [vmem:[#allocation5 + $0x60] sm:$0xff]  ;;  %324 = vmatprep.subr.bf16.mxu0 %v323_v14  ;;  %354 = vmatprep.subr.bf16.mxu1 %v459_v0  ;;  %v327_v23 = vpack.c.bf16 %v58_v21, %v55_v20  ;;  %v59_v26 = vld [vmem:[#allocation5 + $0x88] sm:$0xff]  ;;  %v61_v27 = vld [vmem:[#allocation5 + $0x98] sm:$0xff]  ;;  %v93_v13 = vshrl.u32 %v92_v12, 7  ;;  %p434_p5 = por %p433_p4, %p432_p3 }
  0x2d   :  { %v64_v28 = vld [vmem:[#allocation5 + $0xb0] sm:$0xff]  ;;  %v329_v29 = vpack.c.bf16 %v57_v24, %v54_v22  ;;  %v358_v30 = vpack.c.bf16 %v59_v26, %v56_v25  ;;  %v63_v33 = vld [vmem:[#allocation5 + $0xa8] sm:$0xff]  ;;  %v62_v34 = vld [vmem:[#allocation5 + $0xa0] sm:$0xff] }
  0x2e   :  { %v60_v31 = vld [vmem:[#allocation5 + $0x90] sm:$0xff]  ;;  %v331_v32 = vpack.c.bf16 %v64_v28, %v61_v27  ;;  %v65_v35 = vld [vmem:[#allocation5 + $0xb8] sm:$0xff]  ;;  %v67_v36 = vld [vmem:[#allocation5 + $0xc8] sm:$0xff]  ;;  %v94_v14 = vsub.s32 0, %v93_v13  ;;  %v102_v15 = vsub.s32 2, %v93_v13  ;;  %v98_v17 = vsub.s32 1, %v93_v13  ;;  %p435_p6 = pnand %p434_p5, %p428_p2 }
  0x2f   :  { %326 = vmatpush1.bf16.msra.mxu0 %v325_v18  ;;  %356 = vmatpush3.bf16.msra.mxu1 %v355_v19  ;;  %v70_v37 = vld [vmem:[#allocation5 + $0xe0] sm:$0xff]  ;;  %v333_v38 = vpack.c.bf16 %v63_v33, %v60_v31  ;;  %v361_v39 = vpack.c.bf16 %v65_v35, %v62_v34  ;;  %v69_v42 = vld [vmem:[#allocation5 + $0xd8] sm:$0xff]  ;;  %v68_v43 = vld [vmem:[#allocation5 + $0xd0] sm:$0xff] }
  0x30   :  { %328 = vmatprep.subr.bf16.mxu0 %v327_v23  ;;  %357 = vmatprep.subr.bf16.mxu1 %v459_v0  ;;  %v66_v40 = vld [vmem:[#allocation5 + $0xc0] sm:$0xff]  ;;  %v335_v41 = vpack.c.bf16 %v70_v37, %v67_v36  ;;  %v71_v44 = vld [vmem:[#allocation5 + $0xe8] sm:$0xff]  ;;  %v73_v45 = vld [vmem:[#allocation5 + $0xf8] sm:$0xff] }
  0x31   :  { %v76_v46 = vld [vmem:[#allocation5 + $0x110] sm:$0xff]  ;;  %v337_v47 = vpack.c.bf16 %v69_v42, %v66_v40  ;;  %v364_v48 = vpack.c.bf16 %v71_v44, %v68_v43  ;;  %v75_v51 = vld [vmem:[#allocation5 + $0x108] sm:$0xff]  ;;  %v74_v52 = vld [vmem:[#allocation5 + $0x100] sm:$0xff] }
  0x32   :  { %v72_v49 = vld [vmem:[#allocation5 + $0xf0] sm:$0xff]  ;;  %v339_v50 = vpack.c.bf16 %v76_v46, %v73_v45  ;;  %v77_v53 = vld [vmem:[#allocation5 + $0x118] sm:$0xff]  ;;  %v79_v54 = vld [vmem:[#allocation5 + $0x128] sm:$0xff] }
  0x33   :  { %330 = vmatpush1.bf16.msra.mxu0 %v329_v29  ;;  %359 = vmatpush3.bf16.msra.mxu1 %v358_v30  ;;  %v82_v55 = vld [vmem:[#allocation5 + $0x140] sm:$0xff]  ;;  %v341_v56 = vpack.c.bf16 %v75_v51, %v72_v49  ;;  %v367_v57 = vpack.c.bf16 %v77_v53, %v74_v52  ;;  %v81_v60 = vld [vmem:[#allocation5 + $0x138] sm:$0xff]  ;;  %v80_v61 = vld [vmem:[#allocation5 + $0x130] sm:$0xff] }
  0x34   :  { %332 = vmatprep.subr.bf16.mxu0 %v331_v32  ;;  %360 = vmatprep.subr.bf16.mxu1 %v459_v0  ;;  %v78_v58 = vld [vmem:[#allocation5 + $0x120] sm:$0xff]  ;;  %v343_v59 = vpack.c.bf16 %v82_v55, %v79_v54  ;;  %v83_v62 = vld [vmem:[#allocation5 + $0x148] sm:$0xff]  ;;  %v85_v63 = vld [vmem:[#allocation5 + $0x158] sm:$0xff] }
  0x35   :  { %v88_v1 = vld [vmem:[#allocation5 + $0x170] sm:$0xff]  ;;  %v345_v2 = vpack.c.bf16 %v81_v60, %v78_v58  ;;  %v370_v3 = vpack.c.bf16 %v83_v62, %v80_v61  ;;  %v87_v6 = vld [vmem:[#allocation5 + $0x168] sm:$0xff]  ;;  %v86_v7 = vld [vmem:[#allocation5 + $0x160] sm:$0xff] }
  0x36   :  { %v84_v4 = vld [vmem:[#allocation5 + $0x150] sm:$0xff]  ;;  %v347_v5 = vpack.c.bf16 %v88_v1, %v85_v63  ;;  %v89_v8 = vld [vmem:[#allocation5 + $0x178] sm:$0xff] }
  0x37   :  { %334 = vmatpush1.bf16.msra.mxu0 %v333_v38  ;;  %362 = vmatpush3.bf16.msra.mxu1 %v361_v39  ;;  %v349_v9 = vpack.c.bf16 %v87_v6, %v84_v4  ;;  %v373_v10 = vpack.c.bf16 %v89_v8, %v86_v7  ;;  %v41_v11 = vld [vmem:[#allocation2] sm:$0xff] }
  0x38   :  { %336 = vmatprep.subr.bf16.mxu0 %v335_v41  ;;  %363 = vmatprep.subr.bf16.mxu1 %v459_v0  ;;  %v90_v16 = vld [vmem:[%s539_s2] sm:$0x7] }
  0x39   :  { %v95_v18 = vrot.slane %v90_v16, %v94_v14  ;;  %v103_v19 = vrot.slane %v90_v16, %v102_v15  ;;  %v99_v20 = vrot.slane %v90_v16, %v98_v17 }
  0x3b   :  { %338 = vmatpush1.bf16.msra.mxu0 %v337_v47  ;;  %365 = vmatpush3.bf16.msra.mxu1 %v364_v48 }
  0x3c   :  { %340 = vmatprep.subr.bf16.mxu0 %v339_v50  ;;  %366 = vmatprep.subr.bf16.mxu1 %v459_v0 }
  0x3f   :  { %342 = vmatpush1.bf16.msra.mxu0 %v341_v56  ;;  %368 = vmatpush3.bf16.msra.mxu1 %v367_v57 }
  0x40   :  { %344 = vmatprep.subr.bf16.mxu0 %v343_v59  ;;  %369 = vmatprep.subr.bf16.mxu1 %v459_v0 }
  0x43   :  { %346 = vmatpush1.bf16.msra.mxu0 %v345_v2  ;;  %371 = vmatpush3.bf16.msra.mxu1 %v370_v3 }
  0x44   :  { %348 = vmatprep.subr.bf16.mxu0 %v347_v5  ;;  %372 = vmatprep.subr.bf16.mxu1 %v459_v0 }
  0x47   :  { %350 = vmatpush1.bf16.msra.mxu0 %v349_v9  ;;  %374 = vmatpush3.bf16.msra.mxu1 %v373_v10 }
  0x4a   :  { %172 = vmatmul.mubr.f32.vlgmr.msra.gmra.mrb[0].mxu0 %v41_v11  ;;  %317 = vmatmul.mubr.f32.vlgmr.msra.gmra.mrb[0].mxu1 %v41_v11 }
 0x11d   :  { %v173_v0 = vpop.f32.mrb[0].mxu0  ;;  %v244_v21 = vpop.f32.mrb[0].mxu1 }
 0x11e   :  { %v174_v22 = vadd.f32 %v173_v0, %v95_v18  ;;  %v245_v23 = vadd.f32 %v244_v21, %v103_v19  ;;  %v175_v24 = vpop.f32.mrb[1].mxu0  ;;  %v318_v25 = vpop.f32.mrb[1].mxu1 }
 0x11f   :  { %v176_v26 = vadd.f32 %v175_v24, %v99_v20 }
 0x120   :  { %248 = vst [vmem:[#allocation7] sm:$0xff] %v174_v22  ;;  %250 = vst [vmem:[#allocation7 + $0x10] sm:$0xff] %v245_v23 }
 0x121   :  { %249 = vst [vmem:[#allocation7 + $0x8] sm:$0xff] %v176_v26 }
 0x122   :  { %438 = shalt.err (!%p435_p6)
}
 0x123   :  { %s439_s15 = scalar_lea.hbm %s540_s3, 384 }
 0x124   :  { %p440_p7 = scmp.ne.s32.totalorder %s540_s3, %s439_s15  ;;  %p443_p8 = scmp.lt.u32.totalorder %s439_s15, %s540_s3 }
 0x126   :  { %p445_p9 = pnand %p443_p8, %p440_p7 }
 0x128   :  { %448 = shalt.err (!%p445_p9)
}
 0x129   :  { %260 = dma.vmem_to_hbm [thread:$0]  %s258_s12, 384, %s540_s3, [#allocation4]  }
 0x12a   :  { %453 = dma.done.wait [#allocation4], 384  }
 0x12b   :  { %454 = vsyncadd [#allocation4], 4294966912 }
 0x12c   :  { %264 = vsyncpa [#allocation3], 1 }
 0x12d   :  { %265 = vsyncpa [#allocation6], 1 }
 0x12e   :  { %266 = vsyncpa [#allocation4], 1 }

</bundles_post_ra>
